<compile_context>
chip_gen: v5e
topology: v5e:2x2
jax: 0.10.0
libtpu: 0.0.40
codegen_flags: <defaults>
</compile_context>

<pallas_src>
import jax
import jax.numpy as jnp
from jax import lax
from jax.experimental import pallas as pl
from jax.experimental.pallas import tpu as pltpu


_INV_SQRT2 = 0.7071067811865476  # 1/sqrt(2) for the exact (erf) GELU.


def _round_up(x, m):
    return ((x + m - 1) // m) * m


def _cdiv(a, b):
    return -(-a // b)


def _tpu_hw_params():
    """Returns (feature_alignment, vmem_capacity_bytes) with safe fallbacks."""
    vmem_cap = 64 * 1024 * 1024  # conservative fallback (v7x per-TC VMEM)
    try:
        info = pltpu.get_tpu_info()
        vmem_cap = int(getattr(info, "vmem_capacity_bytes", vmem_cap))
    except Exception:
        pass
    falign = 128  # v5e (4x128x128 MXU): 128 alignment already optimal
    try:
        kind = jax.devices()[0].device_kind.lower()
        if ("v6" in kind) or ("v7" in kind) or ("trillium" in kind):
            falign = 256  # v6e / v7x: 2x256x256 MXU -> full-tile passes
    except Exception:
        pass
    return falign, vmem_cap


def _vmem_footprint(tm_e, tf_e, dmp, itemsize, single):
    """Estimated VMEM bytes for one grid step (double-buffered tiles +
    Mosaic-internal intermediates)."""
    est = (
        2 * tm_e * dmp * itemsize      # x tile
        + 2 * dmp * tf_e * itemsize    # W1 chunk
        + 2 * tf_e * 4                 # b1 chunk (f32)
        + 2 * tf_e * dmp * itemsize    # W2 chunk
        + 2 * dmp * 4                  # b2 (f32)
        + 2 * tm_e * 4                 # keep column
        + 2 * tm_e * dmp * itemsize    # out tile
        + tm_e * tf_e * 4              # GELU intermediate h (f32)
        + tm_e * tf_e * itemsize       # h cast copy fed to 2nd matmul
    )
    if not single:
        est += tm_e * dmp * 4          # f32 accumulator scratch
    return est


def _ffn_kernel_single(x_ref, w1_ref, b1_ref, w2_ref, b2_ref, keep_ref, o_ref):
    """Whole d_ff in one chunk: no accumulator, straight write to o_ref."""
    h = jnp.dot(x_ref[...], w1_ref[...], preferred_element_type=jnp.float32)
    h = h + b1_ref[...].astype(jnp.float32)
    # Exact GELU (erf form), matching PyTorch nn.GELU() default.
    h = 0.5 * h * (1.0 + lax.erf(h * _INV_SQRT2))
    # Dropout == identity (eval mode).
    y = jnp.dot(h.astype(w2_ref.dtype), w2_ref[...],
                preferred_element_type=jnp.float32)
    y = (y + b2_ref[...].astype(jnp.float32)) * keep_ref[...]
    o_ref[...] = y.astype(o_ref.dtype)


def _ffn_kernel_chunked(x_ref, w1_ref, b1_ref, w2_ref, b2_ref, keep_ref,
                        o_ref, acc_ref):
    """d_ff chunked on grid axis 1 with an f32 VMEM accumulator."""
    k = pl.program_id(1)
    nk = pl.num_programs(1)

    @pl.when(k == 0)
    def _init():
        acc_ref[...] = jnp.zeros_like(acc_ref)

    h = jnp.dot(x_ref[...], w1_ref[...], preferred_element_type=jnp.float32)
    h = h + b1_ref[...].astype(jnp.float32)
    h = 0.5 * h * (1.0 + lax.erf(h * _INV_SQRT2))
    acc_ref[...] += jnp.dot(h.astype(w2_ref.dtype), w2_ref[...],
                            preferred_element_type=jnp.float32)

    @pl.when(k == nk - 1)
    def _finalize():
        y = (acc_ref[...] + b2_ref[...].astype(jnp.float32)) * keep_ref[...]
        o_ref[...] = y.astype(o_ref.dtype)


def make_positionwise_feed_forward(w1, b1, w2, b2, *, tm=None, tf=None,
                                   compute_dtype=None):
    """Pre-pads / casts the weights once and returns `apply(x, mask=None)`.

    w1: [d_model, d_ff], b1: [d_ff], w2: [d_ff, d_model], b2: [d_model].
    compute_dtype: optional dtype for the MXU inputs (e.g. jnp.bfloat16);
      accumulation is always f32.  Defaults to w1.dtype.
    """
    d_model, d_ff = w1.shape
    assert w2.shape == (d_ff, d_model)

    cdt = jnp.dtype(compute_dtype) if compute_dtype is not None else jnp.dtype(w1.dtype)
    itemsize = cdt.itemsize
    sublane = {4: 8, 2: 16, 1: 32}.get(itemsize, 8)

    falign, vmem_cap = _tpu_hw_params()
    budget = int(0.75 * vmem_cap)  # headroom for compiler scratch (v7x: ~48 MiB)

    dmp = _round_up(d_model, falign)
    dfp0 = _round_up(d_ff, falign)

    def fits(tm_c, tf_c, single):
        return int(1.25 * _vmem_footprint(tm_c, tf_c, dmp, itemsize, single)) <= budget

    def select_nk(tm_c):
        nk = 1
        while True:
            tf_c = _round_up(_cdiv(dfp0, nk), 128)  # lane-dense chunks, minimal padding
            if fits(tm_c, tf_c, nk == 1) or tf_c <= 128:
                return nk, tf_c
            nk += 1

    if tm is None:
        # Default 512-row tile; bump to 1024 only when the whole d_ff still
        # fits as a single chunk (max arithmetic intensity, no extra k-steps).
        nk_big, tf_big = select_nk(1024)
        if nk_big == 1 and fits(1024, tf_big, True):
            tm_cap, nk, tf_eff = 1024, 1, tf_big
        else:
            tm_cap = 512
            nk, tf_eff = select_nk(tm_cap)
    else:
        tm_cap = _round_up(max(sublane, int(tm)), sublane)
        nk, tf_eff = select_nk(tm_cap)

    if tf is not None:  # explicit chunk-size override
        tf_eff = min(_round_up(int(tf), 128), dfp0)
        nk = _cdiv(dfp0, tf_eff)

    dfp = tf_eff * nk

    # Pad / cast the weights ONCE (hoisted out of the per-call path).
    # Padded d_ff columns have zero W1 cols / b1 / W2 rows -> contribute nothing.
    w1p = jnp.pad(w1.astype(cdt), ((0, dmp - d_model), (0, dfp - d_ff)))
    b1p = jnp.pad(b1.astype(jnp.float32).reshape(1, d_ff), ((0, 0), (0, dfp - d_ff)))
    w2p = jnp.pad(w2.astype(cdt), ((0, dfp - d_ff), (0, dmp - d_model)))
    b2p = jnp.pad(b2.astype(jnp.float32).reshape(1, d_model),
                  ((0, 0), (0, dmp - d_model)))

    def apply(x, mask=None):
        assert x.shape[-1] == d_model
        out_dtype = x.dtype
        M = 1
        for d in x.shape[:-1]:
            M *= d
        xm = x.reshape(M, d_model).astype(cdt)

        # Row tiling: large tiles for large M, small padding for ragged M,
        # and >= 2 row blocks (when M allows) for the v7x megacore split.
        tm_req = max(sublane, min(tm_cap, _round_up(M, sublane)))
        n_blocks = _cdiv(M, tm_req)
        if n_blocks < 2 and _round_up(M, sublane) >= 2 * sublane:
            n_blocks = 2
        tm_eff = _round_up(_cdiv(M, n_blocks), sublane)
        Mp = tm_eff * n_blocks

        x2 = jnp.pad(xm, ((0, Mp - M), (0, dmp - d_model)))

        if mask is None:
            keep = jnp.ones((Mp, 1), jnp.float32)
        else:
            keep_rows = (mask.reshape(M, -1).sum(axis=-1) > 0)
            keep = jnp.pad(keep_rows.astype(jnp.float32)[:, None],
                           ((0, Mp - M), (0, 0)))

        fp = _vmem_footprint(tm_eff, tf_eff, dmp, itemsize, nk == 1)
        vmem_limit = min(budget, max(int(1.25 * fp), 32 * 1024 * 1024))

        if nk == 1:
            kernel = _ffn_kernel_single
            grid = (n_blocks,)
            in_specs = [
                pl.BlockSpec((tm_eff, dmp), lambda i: (i, 0)),   # x rows
                pl.BlockSpec((dmp, dfp), lambda i: (0, 0)),      # W1 (whole)
                pl.BlockSpec((1, dfp), lambda i: (0, 0)),        # b1
                pl.BlockSpec((dfp, dmp), lambda i: (0, 0)),      # W2 (whole)
                pl.BlockSpec((1, dmp), lambda i: (0, 0)),        # b2
                pl.BlockSpec((tm_eff, 1), lambda i: (i, 0)),     # keep factor
            ]
            out_specs = pl.BlockSpec((tm_eff, dmp), lambda i: (i, 0))
            scratch = []
            dims = ("parallel",)
        else:
            kernel = _ffn_kernel_chunked
            grid = (n_blocks, nk)
            in_specs = [
                pl.BlockSpec((tm_eff, dmp), lambda i, k: (i, 0)),   # x rows
                pl.BlockSpec((dmp, tf_eff), lambda i, k: (0, k)),   # W1 chunk
                pl.BlockSpec((1, tf_eff), lambda i, k: (0, k)),     # b1 chunk
                pl.BlockSpec((tf_eff, dmp), lambda i, k: (k, 0)),   # W2 chunk
                pl.BlockSpec((1, dmp), lambda i, k: (0, 0)),        # b2
                pl.BlockSpec((tm_eff, 1), lambda i, k: (i, 0)),     # keep factor
            ]
            out_specs = pl.BlockSpec((tm_eff, dmp), lambda i, k: (i, 0))
            scratch = [pltpu.VMEM((tm_eff, dmp), jnp.float32)]
            dims = ("parallel", "arbitrary")

        out = pl.pallas_call(
            kernel,
            out_shape=jax.ShapeDtypeStruct((Mp, dmp), out_dtype),
            grid_spec=pltpu.PrefetchScalarGridSpec(
                num_scalar_prefetch=0,
                grid=grid,
                in_specs=in_specs,
                out_specs=out_specs,
                scratch_shapes=scratch,
            ),
            compiler_params=pltpu.CompilerParams(
                dimension_semantics=dims,
                vmem_limit_bytes=vmem_limit,
            ),
        )(x2, w1p, b1p, w2p, b2p, keep)

        return out[:M, :d_model].reshape(x.shape)

    return apply


def positionwise_feed_forward(x, w1, b1, w2, b2, mask=None, *, tm=None, tf=None,
                              compute_dtype=None):
    """One-shot convenience wrapper.  For repeated calls, build the callable
    once with make_positionwise_feed_forward (weight pad/cast is hoisted)."""
    if compute_dtype is None:
        compute_dtype = x.dtype
    fn = make_positionwise_feed_forward(w1, b1, w2, b2, tm=tm, tf=tf,
                                        compute_dtype=compute_dtype)
    return fn(x, mask)


def _reference(x, w1, b1, w2, b2, mask=None):
    h = jnp.dot(x, w1) + b1
    h = 0.5 * h * (1.0 + lax.erf(h / jnp.sqrt(2.0)))
    y = jnp.dot(h, w2) + b2
    if mask is not None:
        keep = (mask.sum(axis=-1) > 0).astype(y.dtype)[..., None]
        y = y * keep
    return y


if __name__ == "__main__":
    # Small shapes consistent with the module: batch=2, seq=8, d_model=32, d_ff=64.
    B, S, d_model, d_ff = 2, 8, 32, 64

    key = jax.random.PRNGKey(0)
    kx, k1, kb1, k2, kb2, km, k3, k4 = jax.random.split(key, 8)

    # Deterministic parameter init (PyTorch Linear-style uniform bounds).
    lim1 = 1.0 / jnp.sqrt(jnp.float32(d_model))
    lim2 = 1.0 / jnp.sqrt(jnp.float32(d_ff))
    w1 = jax.random.uniform(k1, (d_model, d_ff), jnp.float32, -lim1, lim1)
    b1 = jax.random.uniform(kb1, (d_ff,), jnp.float32, -lim1, lim1)
    w2 = jax.random.uniform(k2, (d_ff, d_model), jnp.float32, -lim2, lim2)
    b2 = jax.random.uniform(kb2, (d_model,), jnp.float32, -lim2, lim2)

    x = jax.random.normal(kx, (B, S, d_model), jnp.float32)
    # Example mask [B, S, K]: some rows all-zero -> those output rows zeroed.
    mask = (jax.random.uniform(km, (B, S, 4)) > 0.5).astype(jnp.float32)

    # Factory form: weights padded/cast once, reused across calls.
    ffn = make_positionwise_feed_forward(w1, b1, w2, b2)

    # No-mask path.
    y = jax.block_until_ready(ffn(x))
    y_ref = _reference(x, w1, b1, w2, b2)
    assert jnp.allclose(y, y_ref, atol=1e-5, rtol=1e-5)

    # Masked path.
    ym = jax.block_until_ready(ffn(x, mask))
    ym_ref = _reference(x, w1, b1, w2, b2, mask)
    assert jnp.allclose(ym, ym_ref, atol=1e-5, rtol=1e-5)

    # Opt-in bf16 compute path (f32 accumulation) -- looser tolerance.
    ffn_bf16 = make_positionwise_feed_forward(w1, b1, w2, b2,
                                              compute_dtype=jnp.bfloat16)
    yb = jax.block_until_ready(ffn_bf16(x, mask))
    assert jnp.allclose(yb.astype(jnp.float32), ym_ref, atol=3e-2, rtol=3e-2)

    # Force the multi-chunk (accumulator) path with a larger d_ff and tf=128.
    d_ff2 = 512
    w1b = jax.random.uniform(k3, (d_model, d_ff2), jnp.float32, -lim1, lim1)
    w2b = jax.random.uniform(k4, (d_ff2, d_model), jnp.float32,
                             -1.0 / jnp.sqrt(jnp.float32(d_ff2)),
                             1.0 / jnp.sqrt(jnp.float32(d_ff2)))
    b1b = jnp.zeros((d_ff2,), jnp.float32)
    b2b = jnp.zeros((d_model,), jnp.float32)
    yc = jax.block_until_ready(
        positionwise_feed_forward(x, w1b, b1b, w2b, b2b, mask=mask, tf=128))
    yc_ref = _reference(x, w1b, b1b, w2b, b2b, mask)
    assert jnp.allclose(yc, yc_ref, atol=2e-4, rtol=2e-4)

    print("KERNEL_OK")
</pallas_src>

<mosaic_0001>
module attributes {stable_mosaic.version = 11 : i64} {
  func.func @_ffn_kernel_single(%arg0: i32, %arg1: memref<8x128xf32, #tpu.memory_space<vmem>>, %arg2: memref<128x128xf32, #tpu.memory_space<vmem>>, %arg3: memref<1x128xf32, #tpu.memory_space<vmem>>, %arg4: memref<128x128xf32, #tpu.memory_space<vmem>>, %arg5: memref<1x128xf32, #tpu.memory_space<vmem>>, %arg6: memref<8x1xf32, #tpu.memory_space<vmem>>, %arg7: memref<8x128xf32, #tpu.memory_space<vmem>>) attributes {dimension_semantics = [#tpu.dimension_semantics<parallel>], iteration_bounds = array<i64: 2>, scalar_prefetch = 0 : i64, scratch_operands = 0 : i64, tpu.core_type = #tpu.core_type<tc>, window_params = [{transform_indices = @transform_0, window_bounds = array<i64: 8, 128>}, {pipeline_mode = #tpu.pipeline_mode<synchronous>, transform_indices = @transform_1, window_bounds = array<i64: 128, 128>}, {pipeline_mode = #tpu.pipeline_mode<synchronous>, transform_indices = @transform_2, window_bounds = array<i64: 1, 128>}, {pipeline_mode = #tpu.pipeline_mode<synchronous>, transform_indices = @transform_3, window_bounds = array<i64: 128, 128>}, {pipeline_mode = #tpu.pipeline_mode<synchronous>, transform_indices = @transform_4, window_bounds = array<i64: 1, 128>}, {transform_indices = @transform_5, window_bounds = array<i64: 8, 1>}, {transform_indices = @transform_6, window_bounds = array<i64: 8, 128>}]} {
    %c0 = arith.constant 0 : index
    %c0_0 = arith.constant 0 : index
    %0 = vector.load %arg1[%c0, %c0_0] : memref<8x128xf32, #tpu.memory_space<vmem>>, vector<8x128xf32>
    %c0_1 = arith.constant 0 : index
    %c0_2 = arith.constant 0 : index
    %1 = vector.load %arg2[%c0_1, %c0_2] : memref<128x128xf32, #tpu.memory_space<vmem>>, vector<128x128xf32>
    %cst = arith.constant dense<0.000000e+00> : vector<8x128xf32>
    %2 = tpu.matmul %0, %1, %cst {dimension_numbers = #tpu.dot_dimension_numbers<[1], [0], [0], [1], [0, 0, 1, 1], [], []>} : vector<8x128xf32>, vector<128x128xf32>, vector<8x128xf32> -> vector<8x128xf32>
    %c0_3 = arith.constant 0 : index
    %c0_4 = arith.constant 0 : index
    %3 = vector.load %arg3[%c0_3, %c0_4] : memref<1x128xf32, #tpu.memory_space<vmem>>, vector<1x128xf32>
    %4 = vector.broadcast %3 : vector<1x128xf32> to vector<8x128xf32>
    %5 = arith.addf %2, %4 : vector<8x128xf32>
    %cst_5 = arith.constant 5.000000e-01 : f32
    %6 = vector.broadcast %cst_5 : f32 to vector<8x128xf32>
    %7 = arith.mulf %6, %5 : vector<8x128xf32>
    %cst_6 = arith.constant 0.707106769 : f32
    %8 = vector.broadcast %cst_6 : f32 to vector<8x128xf32>
    %9 = arith.mulf %5, %8 : vector<8x128xf32>
    %10 = math.erf %9 : vector<8x128xf32>
    %cst_7 = arith.constant 1.000000e+00 : f32
    %11 = vector.broadcast %cst_7 : f32 to vector<8x128xf32>
    %12 = arith.addf %11, %10 : vector<8x128xf32>
    %13 = arith.mulf %7, %12 : vector<8x128xf32>
    %c0_8 = arith.constant 0 : index
    %c0_9 = arith.constant 0 : index
    %14 = vector.load %arg4[%c0_8, %c0_9] : memref<128x128xf32, #tpu.memory_space<vmem>>, vector<128x128xf32>
    %cst_10 = arith.constant dense<0.000000e+00> : vector<8x128xf32>
    %15 = tpu.matmul %13, %14, %cst_10 {dimension_numbers = #tpu.dot_dimension_numbers<[1], [0], [0], [1], [0, 0, 1, 1], [], []>} : vector<8x128xf32>, vector<128x128xf32>, vector<8x128xf32> -> vector<8x128xf32>
    %c0_11 = arith.constant 0 : index
    %c0_12 = arith.constant 0 : index
    %16 = vector.load %arg5[%c0_11, %c0_12] : memref<1x128xf32, #tpu.memory_space<vmem>>, vector<1x128xf32>
    %17 = vector.broadcast %16 : vector<1x128xf32> to vector<8x128xf32>
    %18 = arith.addf %15, %17 : vector<8x128xf32>
    %c0_13 = arith.constant 0 : index
    %c0_14 = arith.constant 0 : index
    %19 = vector.load %arg6[%c0_13, %c0_14] : memref<8x1xf32, #tpu.memory_space<vmem>>, vector<8x1xf32>
    %20 = vector.broadcast %19 : vector<8x1xf32> to vector<8x128xf32>
    %21 = arith.mulf %18, %20 : vector<8x128xf32>
    %c0_15 = arith.constant 0 : index
    %c0_16 = arith.constant 0 : index
    %22 = vector.load %arg7[%c0_15, %c0_16] : memref<8x128xf32, #tpu.memory_space<vmem>>, vector<8x128xf32>
    tpu.vector_store %arg7[%c0_15, %c0_16], %21 {strides = array<i32>} : memref<8x128xf32, #tpu.memory_space<vmem>>, vector<8x128xf32>,
    return
  }
  func.func @transform_0(%arg0: i32) -> (i32, i32) {
    %c0_i32 = arith.constant 0 : i32
    %c0_i32_0 = arith.constant 0 : i32
    return %arg0, %c0_i32 : i32, i32
  }
  func.func @transform_1(%arg0: i32) -> (i32, i32) {
    %c0_i32 = arith.constant 0 : i32
    %c0_i32_0 = arith.constant 0 : i32
    %c0_i32_1 = arith.constant 0 : i32
    return %c0_i32, %c0_i32_0 : i32, i32
  }
  func.func @transform_2(%arg0: i32) -> (i32, i32) {
    %c0_i32 = arith.constant 0 : i32
    %c0_i32_0 = arith.constant 0 : i32
    %c0_i32_1 = arith.constant 0 : i32
    return %c0_i32, %c0_i32_0 : i32, i32
  }
  func.func @transform_3(%arg0: i32) -> (i32, i32) {
    %c0_i32 = arith.constant 0 : i32
    %c0_i32_0 = arith.constant 0 : i32
    %c0_i32_1 = arith.constant 0 : i32
    return %c0_i32, %c0_i32_0 : i32, i32
  }
  func.func @transform_4(%arg0: i32) -> (i32, i32) {
    %c0_i32 = arith.constant 0 : i32
    %c0_i32_0 = arith.constant 0 : i32
    %c0_i32_1 = arith.constant 0 : i32
    return %c0_i32, %c0_i32_0 : i32, i32
  }
  func.func @transform_5(%arg0: i32) -> (i32, i32) {
    %c0_i32 = arith.constant 0 : i32
    %c0_i32_0 = arith.constant 0 : i32
    return %arg0, %c0_i32 : i32, i32
  }
  func.func @transform_6(%arg0: i32) -> (i32, i32) {
    %c0_i32 = arith.constant 0 : i32
    %c0_i32_0 = arith.constant 0 : i32
    return %arg0, %c0_i32 : i32, i32
  }
}

</mosaic_0001>

<bundles_post_ra>
// kernel: tpu_custom_call.1
= control target key start
LH: loop header
LB: loop body
LE: loop exit
PB: predicated region body
PF: predicated region fallthrough
CT: control target
= control target key end

     0   :  { %11 = vsyncpa [#allocation3], 0  ;;  %s926_s0 = inlined_call_operand.vmem [shape: f32[16,128], index: 0, kind: input, shape index: {}]   ;;  %s927_s1 = inlined_call_operand.hbm [shape: f32[128,128], index: 1, kind: input, shape index: {}]   ;;  %s928_s2 = inlined_call_operand.vmem [shape: f32[1,128], index: 2, kind: input, shape index: {}]   ;;  %s929_s3 = inlined_call_operand.hbm [shape: f32[128,128], index: 3, kind: input, shape index: {}]   ;;  %s930_s4 = inlined_call_operand.vmem [shape: f32[1,128], index: 4, kind: input, shape index: {}]   ;;  %s931_s5 = inlined_call_operand.vmem [shape: f32[16,1], index: 5, kind: input, shape index: {}]   ;;  %s932_s6 = inlined_call_operand.hbm [shape: f32[16,128], index: 6, kind: output, shape index: {}]  }
   0x1   :  { %12 = vsyncpa [#allocation6], 0 }
   0x2   :  { %13 = vsyncpa [#allocation4], 0 }
   0x3   :  { %15 = vsyncpa [#allocation4 + $0x1], 0  ;;  %s796_s21 = smov 0   ;;  %s798_s22 = smov 0  }
   0x4   :  { %s800_s23 = smov 0   ;;  %s802_s24 = smov 0  }
   0x5 LB: > { %s817_s25 = sadd.s32 4294967295, %s754_s24   ;;  %s540_s26 = sadd.s32 4294967294, %s754_s24   ;;  %s754_s24 = sphi %s802_s24, %s939_s24   ;;  %s750_s23 = sphi %s800_s23, %s938_s23   ;;  %s746_s22 = sphi %s798_s22, %s937_s22   ;;  %s742_s21 = sphi %s796_s21, %s936_s21  }
   0x6   : > { %s821_s27 = sadd.s32 1, %s754_s24   ;;  %s164_s28 = sadd.s32 1, %s750_s23 }
   0x7   : > { %s161_s29 = ssub.s32 %s754_s24, %s821_s27  ;;  %p174_p0 = scmp.ne.s32.totalorder %s750_s23, %s746_s22 }
   0x8   : > { %p162_p1 = scmp.eq.s32.totalorder %s161_s29, 0  ;;  %p175_p2 = scmp.eq.s32.totalorder %s817_s25, 1 }
   0x9   : > { %p180_p3 = scmp.ne.s32.totalorder %s746_s22, %s742_s21  ;;  %p181_p4 = scmp.eq.s32.totalorder %s540_s26, 1 }
   0xa   : > { %s832_s30 = scalar_select %p162_p1, %s750_s23, %s164_s28  }
   0xb   : > { %p834_p5 = por %p175_p2, %p174_p0  ;;  %p838_p6 = por %p181_p4, %p180_p3 }
   0xc   : > { %p541_p7 = scmp.ge.s32.totalorder %s754_s24, 1  ;;  %p188_p8 = scmp.lt.s32.totalorder %s754_s24, 3 }
   0xd   : > { %p577_p9 = scmp.eq.s32.totalorder %s817_s25, 0  ;;  %s199_s12 = sshll.u32 %s927_s1, 4  ;;  %s200_s12 = int_to_ptr.hbm [resolvable:$true] %s199_s12 }
   0xe   : > { %p845_p10 = pnand %p541_p7, %p188_p8  ;;  %s756_s13 = smov [#allocation2]  }
   0xf   : > { %s201_s14 = sshll.u32 %s756_s13, 4  ;;  %s216_s17 = sshll.u32 %s929_s3, 4  ;;  %s202_s14 = int_to_ptr.vmem [resolvable:$true] %s201_s14  ;;  %s217_s17 = int_to_ptr.hbm [resolvable:$true] %s216_s17 }
  0x10   : > { %p566_p11 = pneg %p845_p10  ;;  %s757_s18 = smov 128  }
  0x11   : > { %s758_s19 = smov 8   ;;  %s759_s20 = smov [#allocation5]  }
  0x12   : > { %p567_p12 = pnand %p577_p9, %p566_p11  ;;  %s218_s26 = sshll.u32 %s759_s20, 4  ;;  %s219_s26 = int_to_ptr.vmem [resolvable:$true] %s218_s26 }
  0x13   : > { %251 = sbr.rel (%p845_p10) target bundleno = 371 (0x173), region = 44 }
  0x14   : > { %569 = dma.hbm_to_vmem [thread:$0]  (!%p567_p12), %s200_s12, 2048, %s202_s14, [#allocation3], %s757_s18, %s757_s18, %s758_s19  }
  0x15   : > { %572 = dma.hbm_to_vmem [thread:$0]  (!%p567_p12), %s217_s17, 2048, %s219_s26, [#allocation6], %s757_s18, %s757_s18, %s758_s19  }
  0x18   : > { %729 = dma.done.wait (%p577_p9), [#allocation3], 2048  }
  0x19   : > { %731 = vsyncadd (%p577_p9), [#allocation3], 4294965248 }
  0x1a   : > { %733 = dma.done.wait (%p577_p9), [#allocation6], 2048  }
  0x1b   : > { %735 = vsyncadd (%p577_p9), [#allocation6], 4294965248  ;;  %v314_v0 = vld [vmem:[#allocation2 + $0x78] sm:$0xff]  ;;  %v313_v1 = vld [vmem:[#allocation2 + $0x70] sm:$0xff]  ;;  %p290_p13 = scmp.lt.s32.totalorder %s817_s25, 1  ;;  %v760_v53 = vmov 0  }
  0x1c   : > { %319 = vmatpush.msra.mxu0 %v314_v0  ;;  %v312_v2 = vld [vmem:[#allocation2 + $0x68] sm:$0xff]  ;;  %v311_v3 = vld [vmem:[#allocation2 + $0x60] sm:$0xff]  ;;  %v310_v4 = vld [vmem:[#allocation2 + $0x58] sm:$0xff]  ;;  %619 = vset.pattern.permute.xlu0 %v760_v53  ;;  %s287_s17 = sand.u32 1, %s746_s22   ;;  %s553_s19 = sshll.u32 %s817_s25, 3 }
  0x1d   : > { %v309_v5 = vld [vmem:[#allocation2 + $0x50] sm:$0xff]  ;;  %v308_v6 = vld [vmem:[#allocation2 + $0x48] sm:$0xff]  ;;  %v307_v7 = vld [vmem:[#allocation2 + $0x40] sm:$0xff]  ;;  %s871_s28 = scalar_select %p290_p13, %s817_s25, 1 }
  0x1e   : > { %320 = vmatpush.msra.mxu0 %v313_v1  ;;  %v306_v8 = vld [vmem:[#allocation2 + $0x38] sm:$0xff]  ;;  %v305_v9 = vld [vmem:[#allocation2 + $0x30] sm:$0xff]  ;;  %v304_v10 = vld [vmem:[#allocation2 + $0x28] sm:$0xff]  ;;  %s548_s18 = sshll.u32 %s287_s17, 3  ;;  %s442_s9 = scalar_lea.hbm %s932_s6, %s553_s19 }
  0x1f   : > { %v303_v11 = vld [vmem:[#allocation2 + $0x20] sm:$0xff]  ;;  %v302_v12 = vld [vmem:[#allocation2 + $0x18] sm:$0xff]  ;;  %s549_s29 = sshll.u32 %s871_s28, 3  ;;  %v301_v13 = vld [vmem:[#allocation2 + $0x10] sm:$0xff]  ;;  %s289_s10 = scalar_lea.vmem [#allocation7], %s548_s18 }
  0x20   : > { %321 = vmatpush.msra.mxu0 %v312_v2  ;;  %v300_v14 = vld [vmem:[#allocation2 + $0x8] sm:$0xff]  ;;  %s293_s11 = scalar_lea.vmem %s926_s0, %s549_s29  ;;  %v299_v15 = vld [vmem:[#allocation2] sm:$0xff]  ;;  %v398_v17 = vld [vmem:[#allocation5 + $0x78] sm:$0xff]  ;;  %s297_s16 = scalar_lea.vmem %s931_s5, %s549_s29 }
  0x21   : > { %v298_v16 = vld [vmem:[%s293_s11] sm:$0xff]  ;;  %403 = vmatpush.msra.mxu1 %v398_v17  ;;  %v397_v18 = vld [vmem:[#allocation5 + $0x70] sm:$0xff]  ;;  %v396_v19 = vld [vmem:[#allocation5 + $0x68] sm:$0xff]  ;;  %s444_s11 = sshll.u32 %s289_s10, 4  ;;  %s446_s12 = sshll.u32 %s442_s9, 4  ;;  %s445_s11 = int_to_ptr.vmem [resolvable:$true] %s444_s11  ;;  %s447_s12 = int_to_ptr.hbm [resolvable:$true] %s446_s12 }
  0x22   : > { %322 = vmatpush.msra.mxu0 %v311_v3  ;;  %v395_v20 = vld [vmem:[#allocation5 + $0x60] sm:$0xff]  ;;  %v394_v22 = vld [vmem:[#allocation5 + $0x58] sm:$0xff]  ;;  %v393_v23 = vld [vmem:[#allocation5 + $0x50] sm:$0xff]  ;;  %s432_s25 = scalar_lea.sflag [#allocation4], %s287_s17  ;;  %s698_s13 = sshra.s32 %s447_s12, 4  ;;  %s699_s13 = int_to_ptr.hbm [resolvable:$true] %s698_s13 }
  0x23   : > { %404 = vmatpush.msra.mxu1 %v397_v18  ;;  %v620_v21 = vld [vmem:[%s928_s2] ss:$0 sm:$0xff]  ;;  %v392_v25 = vld [vmem:[#allocation5 + $0x48] sm:$0xff]  ;;  %v390_v29 = vld [vmem:[#allocation5 + $0x38] sm:$0xff]  ;;  %s700_s14 = scalar_lea.hbm %s699_s13, 8  ;;  %s704_s19 = scalar_lea.hbm %s932_s6, 16 }
  0x24   : > { %323 = vmatpush.msra.mxu0 %v310_v4  ;;  %v391_v27 = vld [vmem:[#allocation5 + $0x40] sm:$0xff]  ;;  %v389_v31 = vld [vmem:[#allocation5 + $0x30] sm:$0xff]  ;;  %v388_v33 = vld [vmem:[#allocation5 + $0x28] sm:$0xff]  ;;  %p701_p0 = scmp.ne.s32.totalorder %s699_s13, %s700_s14  ;;  %p705_p3 = scmp.lt.s32.totalorder %s699_s13, %s932_s6 }
  0x25   : > { %405 = vmatpush.msra.mxu1 %v396_v19  ;;  %v387_v36 = vld [vmem:[#allocation5 + $0x20] sm:$0xff]  ;;  %v386_v39 = vld [vmem:[#allocation5 + $0x18] sm:$0xff]  ;;  %v385_v42 = vld [vmem:[#allocation5 + $0x10] sm:$0xff]  ;;  %p706_p4 = scmp.lt.s32.totalorder %s704_s19, %s700_s14 }
  0x26   : > { %324 = vmatpush.msra.mxu0 %v309_v5  ;;  %v384_v45 = vld [vmem:[#allocation5 + $0x8] sm:$0xff]  ;;  %v383_v47 = vld [vmem:[#allocation5] sm:$0xff]  ;;  %p702_p1 = pnand %p701_p0, %p834_p5 }
  0x27   : > { %406 = vmatpush.msra.mxu1 %v395_v20  ;;  %v423_v51 = vld [vmem:[%s297_s16] sm:$0xff]  ;;  %p707_p7 = por %p706_p4, %p705_p3 }
  0x28   : > { %325 = vmatpush.msra.mxu0 %v308_v6  ;;  %426 = vperm.xlu0 %619, %v423_v51   ;;  %p703_p2 = pneg %p702_p1 }
  0x29   : > { %407 = vmatpush.msra.mxu1 %v394_v22 }
  0x2a   : > { %326 = vmatpush.msra.mxu0 %v307_v7  ;;  %p708_p8 = pnand %p707_p7, %p703_p2 }
  0x2b   : > { %408 = vmatpush.msra.mxu1 %v393_v23 }
  0x2c   : > { %327 = vmatpush.msra.mxu0 %v306_v8 }
  0x2d   : > { %409 = vmatpush.msra.mxu1 %v392_v25 }
  0x2e   : > { %328 = vmatpush.msra.mxu0 %v305_v9 }
  0x2f   : > { %410 = vmatpush.msra.mxu1 %v391_v27 }
  0x30   : > { %329 = vmatpush.msra.mxu0 %v304_v10 }
  0x31   : > { %411 = vmatpush.msra.mxu1 %v390_v29 }
  0x32   : > { %330 = vmatpush.msra.mxu0 %v303_v11 }
  0x33   : > { %412 = vmatpush.msra.mxu1 %v389_v31 }
  0x34   : > { %331 = vmatpush.msra.mxu0 %v302_v12 }
  0x35   : > { %413 = vmatpush.msra.mxu1 %v388_v33 }
  0x36   : > { %332 = vmatpush.msra.mxu0 %v301_v13  ;;  %v621_v13 = vld [vmem:[%s930_s4] ss:$0 sm:$0xff] }
  0x37   : > { %414 = vmatpush.msra.mxu1 %v387_v36 }
  0x38   : > { %333 = vmatpush.msra.mxu0 %v300_v14 }
  0x39   : > { %415 = vmatpush.msra.mxu1 %v386_v39 }
  0x3a   : > { %334 = vmatpush.msra.mxu0 %v299_v15 }
  0x3b   : > { %335 = vmatmul.f32.vlgmr.msra.gmra.mxu0 %v298_v16  ;;  %416 = vmatpush.msra.mxu1 %v385_v42 }
  0x3d   : > { %417 = vmatpush.msra.mxu1 %v384_v45 }
  0x3f   : > { %418 = vmatpush.msra.mxu1 %v383_v47 }
  0x9a   : > { %v427_v15 = vpop.permute.xlu0 %426 }
  0xb8   : > { %v336_v24 = vpop.f32.mrf.mxu0 }
  0xb9   : > { %v882_v26 = vadd.f32 %v620_v21, %v336_v24 }
  0xbb   : > { %v340_v28 = vmul.f32 0.70710677, %v882_v26  ;;  %v339_v10 = vmul.f32 0.5, %v882_v26 }
  0xbd   : > { %v341_v30 = vmul.f32 %v340_v28, %v340_v28 }
  0xbf   : > { %v342_v32 = vmin.f32 %v341_v30, 16.0 }
  0xc1   : > { %v343_v34 = vmul.f32 2.1237322e-06, %v342_v32  ;;  %v354_v35 = vmul.f32 3.8918573e-05, %v342_v32 }
  0xc3   : > { %v344_v37 = vadd.f32 0.00028619796, %v343_v34  ;;  %v355_v38 = vadd.f32 0.001143296, %v354_v35 }
  0xc5   : > { %v345_v40 = vmul.f32 %v344_v37, %v342_v32  ;;  %v356_v41 = vmul.f32 %v355_v38, %v342_v32 }
  0xc7   : > { %v357_v43 = vadd.f32 0.014752088, %v356_v41  ;;  %v346_v44 = vadd.f32 0.0036580483, %v345_v40 }
  0xc9   : > { %v358_v46 = vmul.f32 %v357_v43, %v342_v32  ;;  %v347_v49 = vmul.f32 %v346_v44, %v342_v32 }
  0xcb   : > { %v359_v48 = vadd.f32 0.112945676, %v358_v46  ;;  %v348_v54 = vadd.f32 0.05243302, %v347_v49 }
  0xcd   : > { %v360_v50 = vmul.f32 %v359_v48, %v342_v32  ;;  %v349_v57 = vmul.f32 %v348_v54, %v342_v32 }
  0xcf   : > { %v361_v52 = vadd.f32 0.4994258, %v360_v50  ;;  %v350_v58 = vadd.f32 0.18741608, %v349_v57 }
  0xd1   : > { %v362_v55 = vmul.f32 %v361_v52, %v342_v32  ;;  %v351_v60 = vmul.f32 %v350_v58, %v342_v32 }
  0xd3   : > { %v363_v56 = vadd.f32 1.0, %v362_v55  ;;  %v352_v0 = vadd.f32 1.1283791, %v351_v60 }
  0xd5   : > { %622 = vrcp.f32 %v363_v56  ;;  %v375_v63 = vand.u32 2147483648, %v363_v56  ;;  %v373_v2 = vand.u32 2147483647, %v363_v56  ;;  %vm369_vm1 = vweird.f32 %v363_v56 }
  0xd6   : > { %v353_v5 = vmul.f32 %v352_v0, %v340_v28 }
  0xd7   : > { %v376_v4 = vor.u32 1.1754944e-38, %v375_v63  ;;  %vm374_vm3 = vcmp.eq.f32.partialorder %v373_v2, 8.507059e+37 }
  0xdb   : > { %v623_v59 = vpop.eup %622 }
  0xdc   : > { %v365_v61 = vmul.f32 %v623_v59, %v363_v56  ;;  %vm370_vm0 = vweird.f32 %v623_v59 }
  0xdd   : > { %vm371_vm2 = vmor %vm369_vm1, %vm370_vm0 }
  0xde   : > { %v366_v62 = vsub.f32 1.0, %v365_v61 }
  0xe0   : > { %v367_v1 = vmul.f32 %v623_v59, %v366_v62 }
  0xe2   : > { %v368_v3 = vadd.f32 %v623_v59, %v367_v1 }
  0xe4   : > { %v372_v6 = vsel %vm371_vm2, %v623_v59, %v368_v3 }
  0xe5   : > { %v377_v7 = vsel %vm374_vm3, %v376_v4, %v372_v6 }
  0xe6   : > { %v378_v8 = vmul.f32 %v377_v7, %v353_v5 }
  0xe8   : > { %v551_v9 = vclamps-f32 %v378_v8, 1.0 }
  0xea   : > { %v381_v11 = vadd.f32 1.0, %v551_v9 }
  0xec   : > { %v382_v12 = vmul.f32 %v381_v11, %v339_v10 }
  0xee   : > { %419 = vmatmul.f32.vlgmr.msra.gmra.mxu1 %v382_v12 }
 0x16b   : > { %v420_v14 = vpop.f32.mrf.mxu1 }
 0x16c   : > { %v421_v16 = vadd.f32 %v621_v13, %v420_v14 }
 0x16e   : > { %v429_v17 = vmul.f32 %v427_v15, %v421_v16 }
 0x170   : > { %430 = vst [vmem:[%s289_s10] sm:$0xff] %v429_v17 }
 0x171   : > { %711 = shalt.err (!%p708_p8)
}
 0x172   : > { %564 = dma.vmem_to_hbm [thread:$0]  (%p834_p5), %s445_s11, 128, %s447_s12, %s432_s25  }
 0x173 PF: > { %p581_p9 = scmp.ge.s32.totalorder %s754_s24, 2  ;;  %s458_s17 = sand.u32 1, %s742_s21  }
 0x174   : > { %s459_s26 = scalar_lea.sflag [#allocation4], %s458_s17 }
 0x175   : > { %p574_p10 = pnand %p581_p9, %p838_p6 }
 0x177   : > { %p575_p11 = pneg %p574_p10 }
 0x179   : > { %737 = dma.done.wait (%p575_p11), %s459_s26, 128  }
 0x17a   : > { %739 = vsyncadd (%p575_p11), %s459_s26, 4294967168  ;;  %p18_p12 = scmp.ge.s32.totalorder %s821_s27, 4   ;;  %s936_s21 = smov %s746_s22 }
 0x17b   : > { %s937_s22 = smov %s750_s23  ;;  %s938_s23 = smov %s832_s30 }
 0x17c   : > { %s939_s24 = smov %s821_s27  ;;  %20 = sbr.rel (!%p18_p12) target bundleno = 5 (0x5), region = 91 }
 0x181   :  { %465 = vsyncpa [#allocation3], 1 }
 0x182   :  { %467 = vsyncpa [#allocation3 + $0x1], 1 }
 0x183   :  { %468 = vsyncpa [#allocation6], 1 }
 0x184   :  { %469 = vsyncpa [#allocation4], 1 }
 0x185   :  { %471 = vsyncpa [#allocation4 + $0x1], 1 }

</bundles_post_ra>
